<compile_context>
chip_gen: v5e
topology: v5e:2x2
jax: 0.10.0
libtpu: 0.0.40
codegen_flags: <defaults>
</compile_context>

<pallas_src>
import functools

import jax
import jax.numpy as jnp
from jax.experimental import pallas as pl
from jax.experimental.pallas import tpu as pltpu

_MIB = 1024 * 1024
# Working budget for pipeline buffers; <= ~40 MiB keeps the same tile choices
# safe on v7x (64 MiB physical / 32 MiB scoped default) and v5e/v6e.
_VMEM_BUDGET = 40 * _MIB
_VMEM_LIMIT_CAP = 48 * _MIB


def _round_up(a: int, b: int) -> int:
    return -(-a // b) * b


def _sublane_multiple(dtype) -> int:
    # Packed-sublane multiple: f32 -> 8, bf16/f16 -> 16, 8-bit -> 32.
    return max(8, 32 // jnp.dtype(dtype).itemsize)


def _pipeline_vmem_bytes(tm, tn, tk, in_isz, out_isz, with_acc):
    x_b = 2 * tm * tk * in_isz          # x tile, double-buffered
    w_b = 2 * tk * tn * in_isz          # W^T tile, double-buffered
    b_b = 2 * max(tn, 128) * 4          # bias (f32), tiny
    o_b = 2 * tm * tn * out_isz         # output tile, double-buffered
    acc = tm * tn * 4 if with_acc else 0
    return x_b + w_b + b_b + o_b + acc


def _choose_tiles(B, D, C, in_isz, out_isz):
    """Returns (tm, tn, tk, full_k)."""
    tm = B if B <= 512 else 512          # 512 is a multiple of 8/16/32
    tn = C if C <= 512 else 512          # 512 is a multiple of 256 (v6e/v7x MXU)
    # Prefer full-K residency: collapses the reduction grid axis entirely.
    if _pipeline_vmem_bytes(tm, tn, D, in_isz, out_isz, False) <= _VMEM_BUDGET:
        return tm, tn, D, True
    # Otherwise stream K in large 256-aligned chunks with an f32 accumulator.
    tk = 2048
    while tk > 256 and _pipeline_vmem_bytes(tm, tn, tk, in_isz, out_isz, True) > _VMEM_BUDGET:
        tk //= 2
    return tm, tn, tk, False


def _probe_kernel_fullk(x_ref, wt_ref, b_ref, o_ref):
    """One (tm, tn) output tile; whole contraction dim resident in VMEM."""
    acc = jnp.dot(x_ref[...], wt_ref[...], preferred_element_type=jnp.float32)
    o_ref[...] = (acc + b_ref[...].astype(jnp.float32)).astype(o_ref.dtype)


def _probe_kernel_ksplit(x_ref, wt_ref, b_ref, o_ref, acc_ref):
    """K-split variant: K is the innermost ('arbitrary') reduction grid axis."""
    k = pl.program_id(2)

    @pl.when(k == 0)
    def _init():
        acc_ref[...] = jnp.zeros_like(acc_ref)

    acc_ref[...] += jnp.dot(
        x_ref[...], wt_ref[...], preferred_element_type=jnp.float32
    )

    @pl.when(k == pl.num_programs(2) - 1)
    def _finalize():
        o_ref[...] = (acc_ref[...] + b_ref[...].astype(jnp.float32)).astype(
            o_ref.dtype
        )


def prepare_probe_params(weight, bias, compute_dtype=None):
    """One-time parameter transform (do this OUTSIDE the hot loop).

    weight: (C, D) torch.nn.Linear layout -> W^T (D, C) [+ optional cast];
    bias:   (C,) -> (1, C) f32.
    """
    w_t = weight.T
    if compute_dtype is not None:
        w_t = w_t.astype(compute_dtype)
    bias_2d = bias.reshape(1, -1).astype(jnp.float32)
    return w_t, bias_2d


@functools.partial(jax.jit, static_argnames=("out_dtype",))
def linear_probe_apply(x, w_t, bias_2d, out_dtype=None):
    """y = x @ w_t + bias, with w_t = weight.T already prepared.

    x: (B, D), w_t: (D, C), bias_2d: (1, C) f32. Returns (B, C) in out_dtype
    (defaults to x.dtype).
    """
    B, D = x.shape
    D2, C = w_t.shape
    assert D == D2, "w_t must be (input_dim, num_classes)"
    if out_dtype is None:
        out_dtype = x.dtype
    if x.dtype != w_t.dtype:  # only when caller opted into bf16/fp8 weights
        x = x.astype(w_t.dtype)

    in_isz = jnp.dtype(x.dtype).itemsize
    out_isz = jnp.dtype(out_dtype).itemsize
    sub = _sublane_multiple(x.dtype)

    tm, tn, tk, full_k = _choose_tiles(B, D, C, in_isz, out_isz)

    nm, nn = pl.cdiv(B, tm), pl.cdiv(C, tn)
    # v7x megacore: ensure >= 2 blocks along a parallel axis when we can split
    # the M tile without violating the sublane multiple. (No-op on v5e/v6e.)
    if nm * nn == 1:
        half = tm // 2
        if half >= sub and half % sub == 0:
            tm = half
            nm = pl.cdiv(B, tm)

    cost = pl.CostEstimate(
        flops=2 * B * D * C,
        transcendentals=0,
        bytes_accessed=(B * D + D * C) * in_isz + C * 4 + B * C * out_isz,
    )

    if full_k:
        vmem_bytes = _pipeline_vmem_bytes(tm, tn, D, in_isz, out_isz, False)
        vmem_limit = min(_VMEM_LIMIT_CAP, max(16 * _MIB, int(vmem_bytes * 1.25) + 2 * _MIB))
        return pl.pallas_call(
            _probe_kernel_fullk,
            out_shape=jax.ShapeDtypeStruct((B, C), out_dtype),
            grid_spec=pltpu.PrefetchScalarGridSpec(
                num_scalar_prefetch=0,
                grid=(nm, nn),
                in_specs=[
                    pl.BlockSpec((tm, D), lambda i, j: (i, 0)),   # x tile (full K)
                    pl.BlockSpec((D, tn), lambda i, j: (0, j)),   # W^T tile (full K)
                    pl.BlockSpec((1, tn), lambda i, j: (0, j)),   # bias
                ],
                out_specs=pl.BlockSpec((tm, tn), lambda i, j: (i, j)),
            ),
            compiler_params=pltpu.CompilerParams(
                dimension_semantics=("parallel", "parallel"),
                vmem_limit_bytes=vmem_limit,
            ),
            cost_estimate=cost,
        )(x, w_t, bias_2d)

    # K-split path (very large D only).  The contraction dim must be
    # zero-padded for correctness; M/N edge blocks are clipped by Pallas.
    Kp = _round_up(D, tk)
    if Kp != D:
        x = jnp.pad(x, ((0, 0), (0, Kp - D)))
        w_t = jnp.pad(w_t, ((0, Kp - D), (0, 0)))
    nk = Kp // tk
    vmem_bytes = _pipeline_vmem_bytes(tm, tn, tk, in_isz, out_isz, True)
    vmem_limit = min(_VMEM_LIMIT_CAP, max(16 * _MIB, int(vmem_bytes * 1.25) + 2 * _MIB))
    return pl.pallas_call(
        _probe_kernel_ksplit,
        out_shape=jax.ShapeDtypeStruct((B, C), out_dtype),
        grid_spec=pltpu.PrefetchScalarGridSpec(
            num_scalar_prefetch=0,
            grid=(nm, nn, nk),
            in_specs=[
                pl.BlockSpec((tm, tk), lambda i, j, k: (i, k)),   # x tile
                pl.BlockSpec((tk, tn), lambda i, j, k: (k, j)),   # W^T tile
                pl.BlockSpec((1, tn), lambda i, j, k: (0, j)),    # bias, resident over K
            ],
            out_specs=pl.BlockSpec((tm, tn), lambda i, j, k: (i, j)),
            scratch_shapes=[pltpu.VMEM((tm, tn), jnp.float32)],
        ),
        compiler_params=pltpu.CompilerParams(
            dimension_semantics=("parallel", "parallel", "arbitrary"),
            vmem_limit_bytes=vmem_limit,
        ),
        cost_estimate=cost,
    )(x, w_t, bias_2d)


def linear_probe(x, weight, bias, *, compute_dtype=None):
    """Convenience one-shot wrapper (torch.nn.Linear.forward semantics).

    For repeated calls in a hot loop, call prepare_probe_params() once and
    reuse linear_probe_apply(). Pass compute_dtype=jnp.bfloat16 for large
    shapes on any generation (accumulation stays f32).
    """
    w_t, bias_2d = prepare_probe_params(weight, bias, compute_dtype)
    xc = x.astype(compute_dtype) if compute_dtype is not None else x
    return linear_probe_apply(xc, w_t, bias_2d, out_dtype=x.dtype)


if __name__ == "__main__":
    # Small shapes consistent with the module: batch=8, input_dim=32, classes=16.
    B, D, C = 8, 32, 16

    key = jax.random.PRNGKey(0)
    kx, kw, kb = jax.random.split(key, 3)

    x = jax.random.normal(kx, (B, D), dtype=jnp.float32)
    # Deterministic init mimicking nn.Linear's default uniform(-1/sqrt(D), 1/sqrt(D)).
    bound = 1.0 / (D ** 0.5)
    weight = jax.random.uniform(kw, (C, D), jnp.float32, -bound, bound)
    bias = jax.random.uniform(kb, (C,), jnp.float32, -bound, bound)

    out = linear_probe(x, weight, bias)
    out = jax.block_until_ready(out)

    # Reference check in plain JAX.
    ref = x @ weight.T + bias
    assert out.shape == (B, C)
    assert jnp.allclose(out, ref, atol=1e-5, rtol=1e-5)

    print("KERNEL_OK")
</pallas_src>

<mosaic_0001>
module attributes {stable_mosaic.version = 11 : i64} {
  func.func @_probe_kernel_fullk(%arg0: i32, %arg1: i32, %arg2: memref<8x32xf32, #tpu.memory_space<vmem>>, %arg3: memref<32x16xf32, #tpu.memory_space<vmem>>, %arg4: memref<1x16xf32, #tpu.memory_space<vmem>>, %arg5: memref<8x16xf32, #tpu.memory_space<vmem>>) attributes {dimension_semantics = [#tpu.dimension_semantics<parallel>, #tpu.dimension_semantics<parallel>], iteration_bounds = array<i64: 1, 1>, scalar_prefetch = 0 : i64, scratch_operands = 0 : i64, tpu.core_type = #tpu.core_type<tc>, window_params = [{transform_indices = @transform_0, window_bounds = array<i64: 8, 32>}, {transform_indices = @transform_1, window_bounds = array<i64: 32, 16>}, {transform_indices = @transform_2, window_bounds = array<i64: 1, 16>}, {transform_indices = @transform_3, window_bounds = array<i64: 8, 16>}]} {
    %c0 = arith.constant 0 : index
    %c0_0 = arith.constant 0 : index
    %0 = vector.load %arg2[%c0, %c0_0] : memref<8x32xf32, #tpu.memory_space<vmem>>, vector<8x32xf32>
    %c0_1 = arith.constant 0 : index
    %c0_2 = arith.constant 0 : index
    %1 = vector.load %arg3[%c0_1, %c0_2] : memref<32x16xf32, #tpu.memory_space<vmem>>, vector<32x16xf32>
    %cst = arith.constant dense<0.000000e+00> : vector<8x16xf32>
    %2 = tpu.matmul %0, %1, %cst {dimension_numbers = #tpu.dot_dimension_numbers<[1], [0], [0], [1], [0, 0, 1, 1], [], []>} : vector<8x32xf32>, vector<32x16xf32>, vector<8x16xf32> -> vector<8x16xf32>
    %c0_3 = arith.constant 0 : index
    %c0_4 = arith.constant 0 : index
    %3 = vector.load %arg4[%c0_3, %c0_4] : memref<1x16xf32, #tpu.memory_space<vmem>>, vector<1x16xf32>
    %4 = vector.broadcast %3 : vector<1x16xf32> to vector<8x16xf32>
    %5 = arith.addf %2, %4 : vector<8x16xf32>
    %c0_5 = arith.constant 0 : index
    %c0_6 = arith.constant 0 : index
    %6 = vector.load %arg5[%c0_5, %c0_6] : memref<8x16xf32, #tpu.memory_space<vmem>>, vector<8x16xf32>
    tpu.vector_store %arg5[%c0_5, %c0_6], %5 {strides = array<i32>} : memref<8x16xf32, #tpu.memory_space<vmem>>, vector<8x16xf32>,
    return
  }
  func.func @transform_0(%arg0: i32, %arg1: i32) -> (i32, i32) {
    %c0_i32 = arith.constant 0 : i32
    %c0_i32_0 = arith.constant 0 : i32
    return %arg0, %c0_i32 : i32, i32
  }
  func.func @transform_1(%arg0: i32, %arg1: i32) -> (i32, i32) {
    %c0_i32 = arith.constant 0 : i32
    %c0_i32_0 = arith.constant 0 : i32
    return %c0_i32, %arg1 : i32, i32
  }
  func.func @transform_2(%arg0: i32, %arg1: i32) -> (i32, i32) {
    %c0_i32 = arith.constant 0 : i32
    %c0_i32_0 = arith.constant 0 : i32
    return %c0_i32, %arg1 : i32, i32
  }
  func.func @transform_3(%arg0: i32, %arg1: i32) -> (i32, i32) {
    %c0_i32 = arith.constant 0 : i32
    return %arg0, %arg1 : i32, i32
  }
}

</mosaic_0001>

<bundles_post_ra>
// kernel: linear_probe_apply.1
= control target key start
LH: loop header
LB: loop body
LE: loop exit
PB: predicated region body
PF: predicated region fallthrough
CT: control target
= control target key end

     0   :  { %s137_s0 = inlined_call_operand.vmem [shape: f32[8,32], index: 0, kind: input, shape index: {}]   ;;  %s138_s1 = inlined_call_operand.vmem [shape: f32[32,16], index: 1, kind: input, shape index: {}]   ;;  %s139_s2 = inlined_call_operand.vmem [shape: f32[1,16], index: 2, kind: input, shape index: {}]   ;;  %s140_s3 = inlined_call_operand.hbm [shape: f32[8,16], index: 3, kind: output, shape index: {}]  }
   0x1   :  { %v19_v0 = vld [vmem:[%s138_s1 + $0x18] sm:$0xff]  ;;  %v18_v1 = vld [vmem:[%s138_s1 + $0x10] sm:$0xff]  ;;  %v17_v2 = vld [vmem:[%s138_s1 + $0x8] sm:$0xff] }
   0x2   :  { %40 = vmatpush.msra.mxu0 %v19_v0 }
   0x3   :  { %8 = vsyncpa [#allocation3], 0  ;;  %v16_v3 = vld [vmem:[%s138_s1] sm:$0xff]  ;;  %vm24_vm0 = vcmask 261120   ;;  %s95_s24 = smov [#allocation2]   ;;  %s57_s28 = sshll.u32 %s140_s3, 4  ;;  %s58_s28 = int_to_ptr.hbm [resolvable:$true] %s57_s28 }
   0x4   :  { %41 = vmatpush.msra.mxu0 %v18_v1  ;;  %v15_v4 = vld [vmem:[%s137_s0] sm:$0xff]  ;;  %s55_s25 = sshll.u32 %s95_s24, 4  ;;  %vm48_vm1 = vcmask 130048   ;;  %s56_s25 = int_to_ptr.vmem [resolvable:$true] %s55_s25 }
   0x5   :  { %v68_v5 = vld [vmem:[%s139_s2] ss:$0 sm:$0xff] }
   0x6   :  { %42 = vmatpush.msra.mxu0 %v17_v2 }
   0x8   :  { %43 = vmatpush.msra.mxu0 %v16_v3 }
   0x9   :  { %66 = vmatmul.msk.f32.vlgmr.msra.gmra.mxu0 %vm24_vm0, %v15_v4 }
  0x86   :  { %v45_v6 = vpop.f32.mrf.mxu0 }
  0x87   :  { %v46_v7 = vadd.f32 %v68_v5, %v45_v6 }
  0x89   :  { %49 = vst.msk [vmem:[#allocation2] sm:$0xff] %vm48_vm1, %v46_v7 }
  0x8a   :  { %60 = dma.vmem_to_hbm [thread:$0]  %s56_s25, 128, %s58_s28, [#allocation3]  }
  0x8b   :  { %93 = dma.done.wait [#allocation3], 128  }
  0x8c   :  { %94 = vsyncadd [#allocation3], 4294967168 }
  0x8d   :  { %65 = vsyncpa [#allocation3], 1 }

</bundles_post_ra>
